<compile_context>
chip_gen: v7x
topology: tpu7x:2x2x1
jax: 0.10.0
libtpu: 0.0.40
codegen_flags: <defaults>
</compile_context>

<pallas_src>
import functools

import jax
import jax.numpy as jnp
from jax.experimental import pallas as pl
from jax.experimental.pallas import tpu as pltpu


def _sent_embedding_kernel(x_ref, ids_ref, pos_ref, seg_ref, gamma_ref,
                           beta_ref, o_ref, *, eps, type_vocab):
    # Per grid step (b, s):
    #   x_ref:     (1, TS, H)  inputs_embeds tile
    #   ids_ref:   (1, TS, 1)  token_type_ids tile (int32, sublane-major column)
    #   pos_ref:   (TS, H)     position-embedding rows for this seq tile
    #   seg_ref:   (V, H)      segment (token-type) embedding table
    #   gamma_ref: (1, H)      LayerNorm weight
    #   beta_ref:  (1, H)      LayerNorm bias
    #   o_ref:     (1, TS, H)  output tile
    x = x_ref[0].astype(jnp.float32)                       # (TS, H)
    ids_col = ids_ref[0]                                   # (TS, 1) int32
    pos = pos_ref[...].astype(jnp.float32)                 # (TS, H)
    seg = seg_ref[...].astype(jnp.float32)                 # (V, H)
    gamma = gamma_ref[...].astype(jnp.float32)             # (1, H)
    beta = beta_ref[...].astype(jnp.float32)               # (1, H)

    # Segment-embedding "gather" as a VPU select over the tiny static vocab.
    # ids matches exactly one v, so the sum of selects equals the gather.
    seg_emb = jnp.where(ids_col == 0, seg[0][None, :], 0.0)        # (TS, H)
    for v in range(1, type_vocab):
        seg_emb = seg_emb + jnp.where(ids_col == v, seg[v][None, :], 0.0)

    emb = x + pos + seg_emb                                # (TS, H)

    # LayerNorm over hidden (lane) axis; mean via sum * (1/H) constant.
    inv_h = 1.0 / emb.shape[-1]
    mean = jnp.sum(emb, axis=-1, keepdims=True) * inv_h
    centered = emb - mean
    var = jnp.sum(centered * centered, axis=-1, keepdims=True) * inv_h
    normed = centered * jax.lax.rsqrt(var + eps)
    out = normed * gamma + beta

    # Dropout is identity in eval mode.
    # TODO(synk): training-mode dropout (RNG masking) not implemented.
    o_ref[0] = out.astype(o_ref.dtype)


def _choose_seq_tile(S, H, itemsize, target_bytes=2 << 20):
    """Pick a seq-tile row count: multiple of 8, ~target_bytes per I/O block."""
    rows = max(8, target_bytes // max(1, H * itemsize))
    if rows >= S:
        return S                       # whole sequence fits in one block
    return max(8, (rows // 8) * 8)


def sent_embedding(inputs_embeds, token_type_ids, pos_table, seg_table,
                   ln_gamma, ln_beta, *, eps=1e-12, ts_rows=None):
    """Pallas wrapper.

    inputs_embeds:  (B, S, H)  any float dtype (kept on HBM path as-is)
    token_type_ids: (B, S)     integer
    pos_table:      (MAX_POS, H)
    seg_table:      (V, H)
    ln_gamma/beta:  (H,)
    """
    B, S, H = inputs_embeds.shape
    V = seg_table.shape[0]

    itemsize = jnp.dtype(inputs_embeds.dtype).itemsize
    pos_itemsize = jnp.dtype(pos_table.dtype).itemsize

    if ts_rows is None:
        ts = _choose_seq_tile(S, H, itemsize)
    else:
        ts = min(int(ts_rows), S)
        if ts != S:
            ts = max(8, (ts // 8) * 8)

    # Glue: slice the position table to the current sequence length
    # (matches self.position_ids[:, :seq_length] lookup).
    pos = pos_table[:S]                                    # (S, H)
    gamma2d = ln_gamma.reshape(1, H)
    beta2d = ln_beta.reshape(1, H)
    ids = token_type_ids.astype(jnp.int32).reshape(B, S, 1)

    # VMEM budget (double-buffered streaming blocks + resident tables).
    blk_io = ts * H * itemsize
    blk_pos = ts * H * pos_itemsize
    blk_ids = ts * 4
    fixed = V * H * jnp.dtype(seg_table.dtype).itemsize + 2 * H * 4
    est = 2 * (2 * blk_io + blk_pos + blk_ids) + fixed
    vmem_limit = int(min(max(4 * est, 8 << 20), 48 << 20))

    kernel = functools.partial(_sent_embedding_kernel, eps=eps, type_vocab=V)

    return pl.pallas_call(
        kernel,
        out_shape=jax.ShapeDtypeStruct((B, S, H), inputs_embeds.dtype),
        grid_spec=pltpu.PrefetchScalarGridSpec(
            num_scalar_prefetch=0,
            grid=(B, pl.cdiv(S, ts)),
            in_specs=[
                pl.BlockSpec((1, ts, H), lambda b, s: (b, s, 0)),  # inputs
                pl.BlockSpec((1, ts, 1), lambda b, s: (b, s, 0)),  # type ids
                pl.BlockSpec((ts, H), lambda b, s: (s, 0)),        # pos rows
                pl.BlockSpec((V, H), lambda b, s: (0, 0)),         # seg table
                pl.BlockSpec((1, H), lambda b, s: (0, 0)),         # LN gamma
                pl.BlockSpec((1, H), lambda b, s: (0, 0)),         # LN beta
            ],
            out_specs=pl.BlockSpec((1, ts, H), lambda b, s: (b, s, 0)),
        ),
        compiler_params=pltpu.CompilerParams(
            dimension_semantics=("parallel", "parallel"),
            vmem_limit_bytes=vmem_limit,
        ),
    )(inputs_embeds, ids, pos, seg_table, gamma2d, beta2d)


def sent_embedding_ref(inputs_embeds, token_type_ids, pos_table, seg_table,
                       ln_gamma, ln_beta, *, eps=1e-12):
    """Pure-JAX reference mirroring the PyTorch forward (eval mode)."""
    B, S, H = inputs_embeds.shape
    seg = seg_table[token_type_ids]                        # (B, S, H)
    pos = pos_table[:S][None]                              # (1, S, H)
    emb = inputs_embeds.astype(jnp.float32) + pos + seg
    mean = jnp.mean(emb, axis=-1, keepdims=True)
    var = jnp.mean((emb - mean) ** 2, axis=-1, keepdims=True)
    normed = (emb - mean) / jnp.sqrt(var + eps)
    return (normed * ln_gamma + ln_beta).astype(inputs_embeds.dtype)


if __name__ == "__main__":
    EPS = 1e-12
    key = jax.random.PRNGKey(0)

    # --- Test 1: toy config consistent with the module spec ----------------
    #   hidden_size=32, max_position_embeddings=16, type_vocab_size=2,
    #   layer_norm_eps=1e-12, batch=2, seq=8.
    B, S, H = 2, 8, 32
    MAX_POS, TYPE_VOCAB = 16, 2
    k1, k2, k3, k4, k5, k6, k7, k8 = jax.random.split(key, 8)

    inputs_embeds = jax.random.normal(k1, (B, S, H), dtype=jnp.float32)
    token_type_ids = jax.random.randint(k2, (B, S), 0, TYPE_VOCAB,
                                        dtype=jnp.int32)
    pos_table = 0.02 * jax.random.normal(k3, (MAX_POS, H), dtype=jnp.float32)
    seg_table = 0.02 * jax.random.normal(k4, (TYPE_VOCAB, H),
                                         dtype=jnp.float32)
    ln_gamma = jnp.ones((H,), dtype=jnp.float32)
    ln_beta = jnp.zeros((H,), dtype=jnp.float32)

    out = sent_embedding(inputs_embeds, token_type_ids, pos_table, seg_table,
                         ln_gamma, ln_beta, eps=EPS)
    out = jax.block_until_ready(out)
    ref = sent_embedding_ref(inputs_embeds, token_type_ids, pos_table,
                             seg_table, ln_gamma, ln_beta, eps=EPS)
    assert out.shape == (B, S, H)
    assert jnp.allclose(out, ref, atol=1e-5, rtol=1e-5), "mismatch (test 1)"

    # --- Test 2: exercise the sequence-tiled path (multiple seq tiles) -----
    B2, S2, H2 = 2, 48, 128
    MAX_POS2 = 64
    x2 = jax.random.normal(k5, (B2, S2, H2), dtype=jnp.float32)
    ids2 = jax.random.randint(k6, (B2, S2), 0, TYPE_VOCAB, dtype=jnp.int32)
    pos2 = 0.02 * jax.random.normal(k7, (MAX_POS2, H2), dtype=jnp.float32)
    seg2 = 0.02 * jax.random.normal(k8, (TYPE_VOCAB, H2), dtype=jnp.float32)
    g2 = jnp.ones((H2,), dtype=jnp.float32)
    b2 = jnp.zeros((H2,), dtype=jnp.float32)

    out2 = sent_embedding(x2, ids2, pos2, seg2, g2, b2, eps=EPS, ts_rows=16)
    out2 = jax.block_until_ready(out2)
    ref2 = sent_embedding_ref(x2, ids2, pos2, seg2, g2, b2, eps=EPS)
    assert out2.shape == (B2, S2, H2)
    assert jnp.allclose(out2, ref2, atol=1e-5, rtol=1e-5), "mismatch (test 2)"

    print("KERNEL_OK")
</pallas_src>

<mosaic_0001>
module attributes {stable_mosaic.version = 11 : i64} {
  func.func @_sent_embedding_kernel(%arg0: i32, %arg1: i32, %arg2: memref<1x8x32xf32, #tpu.memory_space<vmem>>, %arg3: memref<1x8x1xi32, #tpu.memory_space<vmem>>, %arg4: memref<8x32xf32, #tpu.memory_space<vmem>>, %arg5: memref<2x32xf32, #tpu.memory_space<vmem>>, %arg6: memref<1x32xf32, #tpu.memory_space<vmem>>, %arg7: memref<1x32xf32, #tpu.memory_space<vmem>>, %arg8: memref<1x8x32xf32, #tpu.memory_space<vmem>>) attributes {dimension_semantics = [#tpu.dimension_semantics<parallel>, #tpu.dimension_semantics<parallel>], iteration_bounds = array<i64: 2, 1>, scalar_prefetch = 0 : i64, scratch_operands = 0 : i64, tpu.core_type = #tpu.core_type<tc>, window_params = [{transform_indices = @transform_0, window_bounds = array<i64: 1, 8, 32>}, {transform_indices = @transform_1, window_bounds = array<i64: 1, 8, 1>}, {transform_indices = @transform_2, window_bounds = array<i64: 8, 32>}, {pipeline_mode = #tpu.pipeline_mode<synchronous>, transform_indices = @transform_3, window_bounds = array<i64: 2, 32>}, {pipeline_mode = #tpu.pipeline_mode<synchronous>, transform_indices = @transform_4, window_bounds = array<i64: 1, 32>}, {pipeline_mode = #tpu.pipeline_mode<synchronous>, transform_indices = @transform_5, window_bounds = array<i64: 1, 32>}, {transform_indices = @transform_6, window_bounds = array<i64: 1, 8, 32>}]} {
    %c0 = arith.constant 0 : index
    %c0_0 = arith.constant 0 : index
    %c0_1 = arith.constant 0 : index
    %0 = vector.load %arg2[%c0, %c0_0, %c0_1] : memref<1x8x32xf32, #tpu.memory_space<vmem>>, vector<1x8x32xf32>
    %1 = vector.shape_cast %0 : vector<1x8x32xf32> to vector<8x32xf32>
    %c0_2 = arith.constant 0 : index
    %c0_3 = arith.constant 0 : index
    %c0_4 = arith.constant 0 : index
    %2 = vector.load %arg3[%c0_2, %c0_3, %c0_4] : memref<1x8x1xi32, #tpu.memory_space<vmem>>, vector<1x8x1xi32>
    %3 = vector.shape_cast %2 : vector<1x8x1xi32> to vector<8x1xi32>
    %c0_5 = arith.constant 0 : index
    %c0_6 = arith.constant 0 : index
    %4 = vector.load %arg4[%c0_5, %c0_6] : memref<8x32xf32, #tpu.memory_space<vmem>>, vector<8x32xf32>
    %c0_7 = arith.constant 0 : index
    %c0_8 = arith.constant 0 : index
    %5 = vector.load %arg5[%c0_7, %c0_8] : memref<2x32xf32, #tpu.memory_space<vmem>>, vector<2x32xf32>
    %c0_9 = arith.constant 0 : index
    %c0_10 = arith.constant 0 : index
    %6 = vector.load %arg6[%c0_9, %c0_10] : memref<1x32xf32, #tpu.memory_space<vmem>>, vector<1x32xf32>
    %c0_11 = arith.constant 0 : index
    %c0_12 = arith.constant 0 : index
    %7 = vector.load %arg7[%c0_11, %c0_12] : memref<1x32xf32, #tpu.memory_space<vmem>>, vector<1x32xf32>
    %c0_i32 = arith.constant 0 : i32
    %8 = vector.broadcast %c0_i32 : i32 to vector<8x1xi32>
    %9 = arith.cmpi eq, %3, %8 : vector<8x1xi32>
    %10 = vector.extract_strided_slice %5 {offsets = [0, 0], sizes = [1, 32], strides = [1, 1]} : vector<2x32xf32> to vector<1x32xf32>
    %11 = vector.shape_cast %10 : vector<1x32xf32> to vector<32xf32>
    %12 = vector.shape_cast %11 : vector<32xf32> to vector<1x32xf32>
    %cst = arith.constant 0.000000e+00 : f32
    %13 = vector.shape_cast %9 : vector<8x1xi1> to vector<8x1xi1>
    %14 = vector.broadcast %13 : vector<8x1xi1> to vector<8x32xi1>
    %15 = vector.shape_cast %12 : vector<1x32xf32> to vector<1x32xf32>
    %16 = vector.broadcast %15 : vector<1x32xf32> to vector<8x32xf32>
    %17 = vector.broadcast %cst : f32 to vector<8x32xf32>
    %18 = arith.select %14, %16, %17 : vector<8x32xi1>, vector<8x32xf32>
    %c1_i32 = arith.constant 1 : i32
    %19 = vector.broadcast %c1_i32 : i32 to vector<8x1xi32>
    %20 = arith.cmpi eq, %3, %19 : vector<8x1xi32>
    %21 = vector.extract_strided_slice %5 {offsets = [1, 0], sizes = [1, 32], strides = [1, 1]} : vector<2x32xf32> to vector<1x32xf32>
    %22 = vector.shape_cast %21 : vector<1x32xf32> to vector<32xf32>
    %23 = vector.shape_cast %22 : vector<32xf32> to vector<1x32xf32>
    %cst_13 = arith.constant 0.000000e+00 : f32
    %24 = vector.shape_cast %20 : vector<8x1xi1> to vector<8x1xi1>
    %25 = vector.broadcast %24 : vector<8x1xi1> to vector<8x32xi1>
    %26 = vector.shape_cast %23 : vector<1x32xf32> to vector<1x32xf32>
    %27 = vector.broadcast %26 : vector<1x32xf32> to vector<8x32xf32>
    %28 = vector.broadcast %cst_13 : f32 to vector<8x32xf32>
    %29 = arith.select %25, %27, %28 : vector<8x32xi1>, vector<8x32xf32>
    %30 = arith.addf %18, %29 : vector<8x32xf32>
    %31 = arith.addf %1, %4 : vector<8x32xf32>
    %32 = arith.addf %31, %30 : vector<8x32xf32>
    %cst_14 = arith.constant dense<0.000000e+00> : vector<8xf32>
    %33 = vector.multi_reduction <add>, %32, %cst_14 [1] : vector<8x32xf32> to vector<8xf32>
    %34 = vector.shape_cast %33 : vector<8xf32> to vector<8x1xf32>
    %cst_15 = arith.constant 3.125000e-02 : f32
    %35 = vector.broadcast %cst_15 : f32 to vector<8x1xf32>
    %36 = arith.mulf %34, %35 : vector<8x1xf32>
    %37 = vector.broadcast %36 : vector<8x1xf32> to vector<8x32xf32>
    %38 = arith.subf %32, %37 : vector<8x32xf32>
    %39 = arith.mulf %38, %38 : vector<8x32xf32>
    %cst_16 = arith.constant dense<0.000000e+00> : vector<8xf32>
    %40 = vector.multi_reduction <add>, %39, %cst_16 [1] : vector<8x32xf32> to vector<8xf32>
    %41 = vector.shape_cast %40 : vector<8xf32> to vector<8x1xf32>
    %cst_17 = arith.constant 3.125000e-02 : f32
    %42 = vector.broadcast %cst_17 : f32 to vector<8x1xf32>
    %43 = arith.mulf %41, %42 : vector<8x1xf32>
    %cst_18 = arith.constant 9.99999996E-13 : f32
    %44 = vector.broadcast %cst_18 : f32 to vector<8x1xf32>
    %45 = arith.addf %43, %44 : vector<8x1xf32>
    %46 = math.rsqrt %45 : vector<8x1xf32>
    %47 = vector.broadcast %46 : vector<8x1xf32> to vector<8x32xf32>
    %48 = arith.mulf %38, %47 : vector<8x32xf32>
    %49 = vector.broadcast %6 : vector<1x32xf32> to vector<8x32xf32>
    %50 = arith.mulf %48, %49 : vector<8x32xf32>
    %51 = vector.broadcast %7 : vector<1x32xf32> to vector<8x32xf32>
    %52 = arith.addf %50, %51 : vector<8x32xf32>
    %c0_19 = arith.constant 0 : index
    %c0_20 = arith.constant 0 : index
    %c0_21 = arith.constant 0 : index
    %53 = vector.load %arg8[%c0_19, %c0_20, %c0_21] : memref<1x8x32xf32, #tpu.memory_space<vmem>>, vector<1x8x32xf32>
    %54 = vector.shape_cast %53 : vector<1x8x32xf32> to vector<8x32xf32>
    %55 = vector.shape_cast %52 : vector<8x32xf32> to vector<1x8x32xf32>
    tpu.vector_store %arg8[%c0_19, %c0_20, %c0_21], %55 {strides = array<i32>} : memref<1x8x32xf32, #tpu.memory_space<vmem>>, vector<1x8x32xf32>,
    return
  }
  func.func @transform_0(%arg0: i32, %arg1: i32) -> (i32, i32, i32) {
    %c0_i32 = arith.constant 0 : i32
    %c0_i32_0 = arith.constant 0 : i32
    return %arg0, %arg1, %c0_i32 : i32, i32, i32
  }
  func.func @transform_1(%arg0: i32, %arg1: i32) -> (i32, i32, i32) {
    %c0_i32 = arith.constant 0 : i32
    %c0_i32_0 = arith.constant 0 : i32
    return %arg0, %arg1, %c0_i32 : i32, i32, i32
  }
  func.func @transform_2(%arg0: i32, %arg1: i32) -> (i32, i32) {
    %c0_i32 = arith.constant 0 : i32
    %c0_i32_0 = arith.constant 0 : i32
    return %arg1, %c0_i32 : i32, i32
  }
  func.func @transform_3(%arg0: i32, %arg1: i32) -> (i32, i32) {
    %c0_i32 = arith.constant 0 : i32
    %c0_i32_0 = arith.constant 0 : i32
    %c0_i32_1 = arith.constant 0 : i32
    return %c0_i32, %c0_i32_0 : i32, i32
  }
  func.func @transform_4(%arg0: i32, %arg1: i32) -> (i32, i32) {
    %c0_i32 = arith.constant 0 : i32
    %c0_i32_0 = arith.constant 0 : i32
    %c0_i32_1 = arith.constant 0 : i32
    return %c0_i32, %c0_i32_0 : i32, i32
  }
  func.func @transform_5(%arg0: i32, %arg1: i32) -> (i32, i32) {
    %c0_i32 = arith.constant 0 : i32
    %c0_i32_0 = arith.constant 0 : i32
    %c0_i32_1 = arith.constant 0 : i32
    return %c0_i32, %c0_i32_0 : i32, i32
  }
  func.func @transform_6(%arg0: i32, %arg1: i32) -> (i32, i32, i32) {
    %c0_i32 = arith.constant 0 : i32
    %c0_i32_0 = arith.constant 0 : i32
    return %arg0, %arg1, %c0_i32 : i32, i32, i32
  }
}

</mosaic_0001>

<bundles_post_ra>
// kernel: tpu_custom_call.1
= control target key start
LH: loop header
LB: loop body
LE: loop exit
PB: predicated region body
PF: predicated region fallthrough
CT: control target
= control target key end

     0   :  { %11 = vsyncpa [#allocation3], 0  ;;  %s814_s0 = inlined_call_operand.vmem [shape: f32[2,8,32], index: 0, kind: input, shape index: {}]   ;;  %s815_s1 = inlined_call_operand.vmem [shape: s32[2,8,1], index: 1, kind: input, shape index: {}]   ;;  %s816_s2 = inlined_call_operand.vmem [shape: f32[8,32], index: 2, kind: input, shape index: {}]   ;;  %s817_s3 = inlined_call_operand.vmem [shape: f32[2,32], index: 3, kind: input, shape index: {}]   ;;  %s818_s4 = inlined_call_operand.vmem [shape: f32[1,32], index: 4, kind: input, shape index: {}]   ;;  %s819_s5 = inlined_call_operand.vmem [shape: f32[1,32], index: 5, kind: input, shape index: {}]   ;;  %s820_s6 = inlined_call_operand.hbm [shape: f32[2,8,32], index: 6, kind: output, shape index: {}]  }
   0x1   :  { %13 = vsyncpa [#allocation3 + $0x1], 0  ;;  %s684_s21 = smov 0   ;;  %s686_s22 = smov 0  }
   0x2   :  { %s688_s23 = smov 0   ;;  %s690_s24 = smov 0  }
   0x3   :  { %s692_s25 = smov 0   ;;  %s694_s26 = smov 0  }
   0x4 LB: > { %s493_s27 = sadd.s32 4294967295, %s645_s26   ;;  %s494_s28 = sadd.s32 4294967294, %s645_s26   ;;  %s645_s26 = sphi %s694_s26, %s19_s26   ;;  %s641_s25 = sphi %s692_s25, %s827_s25   ;;  %s637_s24 = sphi %s690_s24, %s826_s24   ;;  %s633_s23 = sphi %s688_s23, %s825_s23   ;;  %s629_s22 = sphi %s686_s22, %s824_s22   ;;  %s625_s21 = sphi %s684_s21, %s823_s21  }
   0x5   : > { %s31_s29 = sadd.s32 1, %s641_s25  ;;  %s185_s30 = sadd.s32 1, %s633_s23 }
   0x6   : > { %p33_p0 = scmp.ge.s32.totalorder %s31_s29, 2  ;;  %p195_p1 = scmp.ne.s32.totalorder %s633_s23, %s629_s22 }
   0x7   : > { %p196_p2 = scmp.eq.s32.totalorder %s493_s27, 1  ;;  %p201_p3 = scmp.ne.s32.totalorder %s629_s22, %s625_s21 }
   0x8   : > { %s829_s29 = smov (%p33_p0, %s31_s29), 0  ;;  %p202_p5 = scmp.eq.s32.totalorder %s494_s28, 1 }
   0x9   : > { %p724_p4 = por %p196_p2, %p195_p1  ;;  %s180_s8 = ssub.s32 %s641_s25, %s829_s29 }
   0xa   : > { %p498_p6 = scmp.ge.s32.totalorder %s645_s26, 1  ;;  %p183_p7 = scmp.eq.s32.totalorder %s180_s8, 0 }
   0xb   : > { %p731_p8 = por %p202_p5, %p201_p3  ;;  %p256_p9 = scmp.lt.s32.totalorder %s645_s26, 3 }
   0xc   : > { %s737_s10 = scalar_select %p183_p7, %s633_s23, %s185_s30  }
   0xd   : > { %p257_p10 = pnand %p498_p6, %p256_p9 }
   0xe   : > { %p299_p11 = scmp.lt.s32.totalorder (!%p257_p10), %s637_s24, 1  ;;  %v647_v0 = vmov (!%p257_p10), 0   ;;  %v329_v4 = vlaneseq (!%p257_p10)  ;;  %v320_v8 = vld [vmem:[%s817_s3] sm:$0x3] (!%p257_p10)  ;;  %vm348_vm4 = vcmask (!%p257_p10), 261120   ;;  %s296_s30 = sand.u32 (!%p257_p10), 1, %s629_s22  }
   0xf   : > { %260 = sbr.rel (%p257_p10) target bundleno = 494 (0x1ee), region = 44  ;;  %564 = vset.pattern.permute.xlu0 (!%p257_p10), %v647_v0  ;;  %v319_v13 = vld [vmem:[%s816_s2] sm:$0xff] (!%p257_p10)  ;;  %s499_s8 = sshll.u32 (!%p257_p10), %s296_s30, 3 }
  0x10   : > { %v330_v5 = vshrl.u32 (!%p257_p10), %v329_v4, 7  ;;  %v502_v30 = vld [vmem:[%s818_s4] ss:$0 sm:$0xff] (!%p257_p10)  ;;  %s298_s16 = scalar_lea.vmem (!%p257_p10), [#allocation2], %s499_s8  ;;  %s378_s27 = scalar_lea.sflag (!%p257_p10), [#allocation3], %s296_s30 }
  0x11   : > { %v503_v32 = vld [vmem:[%s819_s5] ss:$0 sm:$0xff] (!%p257_p10)  ;;  %s392_s17 = sshll.u32 (!%p257_p10), %s298_s16, 4  ;;  %s768_s17 = int_to_ptr.vmem [resolvable:$true] %s392_s17 }
  0x12   : > { %v331_v6 = vsub.s32 (!%p257_p10), 0, %v330_v5  ;;  %v342_v7 = vsub.s32 (!%p257_p10), 1, %v330_v5  ;;  %s567_s28 = scalar_lea.vmem (!%p257_p10), %s768_s17, 128 }
  0x13   : > { %p568_p12 = scmp.ne.s32.totalorder (!%p257_p10), %s768_s17, %s567_s28 }
  0x14   : > { %v332_v10 = vrot.slane (!%p257_p10), %v320_v8, %v331_v6  ;;  %v343_v11 = vrot.slane (!%p257_p10), %v320_v8, %v342_v7 }
  0x15   : > { %p569_p13 = pnand (!%p257_p10), %p568_p12, %p724_p4 }
  0x16   : > { %s300_s11 = scalar_select %p299_p11, %s637_s24, 1 }
  0x17   : > { %p570_p0 = pneg %p569_p13 }
  0x18   : > { %s500_s12 = sshll.u32 %s300_s11, 3 }
  0x19   : > { %s312_s15 = scalar_lea.vmem %s815_s1, %s500_s12  ;;  %s305_s18 = scalar_lea.vmem %s814_s0, %s500_s12 }
  0x1a   : > { %v318_v1 = vld [vmem:[%s312_s15] sm:$0xff]  ;;  %s505_s15 = sshll.u32 %s637_s24, 7  ;;  %s648_s24 = smov [#allocation2]  }
  0x1b   : > { %vm323_vm0 = vcmp.eq.s32.totalorder %v318_v1, 0  ;;  %vm334_vm1 = vcmp.eq.s32.totalorder %v318_v1, 1  ;;  %v317_v12 = vld [vmem:[%s305_s18] sm:$0xff]  ;;  %s766_s20 = scalar_lea.hbm %s820_s6, %s505_s15  ;;  %s571_s8 = sshll.u32 %s648_s24, 4  ;;  %s572_s8 = int_to_ptr.vmem [resolvable:$false] %s571_s8 }
  0x1c   : > { %v324_v2 = vsel %vm323_vm0, 1, %v647_v0  ;;  %v335_v3 = vsel %vm334_vm1, 1, %v647_v0  ;;  %v346_v15 = vadd.f32 %v319_v13, %v317_v12  ;;  %s573_s11 = scalar_lea.vmem %s572_s8, 256  ;;  %p574_p1 = scmp.lt.s32.totalorder %s768_s17, %s572_s8 }
  0x1d   : > { %326 = vperm.xlu0 %564, %v324_v2   ;;  %p575_p2 = scmp.lt.s32.totalorder %s573_s11, %s567_s28 }
  0x1f   : > { %p576_p3 = por %p575_p2, %p574_p1 }
  0x21   : > { %337 = vperm.xlu0 %564, %v335_v3   ;;  %p577_p5 = pnand %p576_p3, %p570_p0 }
  0x9c   : > { %v327_v9 = vpop.permute.xlu0 %326 }
  0x9d   : > { %vm328_vm2 = vcmp.eq.s32.totalorder %v327_v9, 1 }
  0x9e   : > { %v333_v16 = vsel %vm328_vm2, %v332_v10, 0.0 }
  0xa0   : > { %v338_v14 = vpop.permute.xlu0 %337 }
  0xa1   : > { %vm339_vm3 = vcmp.eq.s32.totalorder %v338_v14, 1 }
  0xa2   : > { %v344_v17 = vsel %vm339_vm3, %v343_v11, 0.0 }
  0xa3   : > { %v345_v18 = vadd.f32 %v344_v17, %v333_v16 }
  0xa5   : > { %v347_v19 = vadd.f32 %v346_v15, %v345_v18 }
  0xa7   : > { %v349_v20 = vsel %vm348_vm4, %v347_v19, 0.0 }
  0xa8   : > { %350 = vadd.xlane.f32.xlu1 %v349_v20 }
 0x135   : > { %v351_v21 = vpop.xlane.xlu1 %350 }
 0x136   : > { %v352_v22 = vmul.f32 0.03125, %v351_v21 }
 0x138   : > { %v353_v23 = vsub.f32 %v347_v19, %v352_v22 }
 0x13a   : > { %v354_v24 = vmul.f32 %v353_v23, %v353_v23 }
 0x13c   : > { %v355_v25 = vsel %vm348_vm4, %v354_v24, 0.0 }
 0x13d   : > { %356 = vadd.xlane.f32.xlu1 %v355_v25 }
 0x1ca   : > { %v357_v26 = vpop.xlane.xlu1 %356 }
 0x1cb   : > { %v358_v27 = vmul.f32 0.03125, %v357_v26 }
 0x1cd   : > { %v359_v28 = vadd.f32 1e-12, %v358_v27 }
 0x1cf   : > { %565 = vrsqrt.f32 %v359_v28 }
 0x1d9   : > { %v566_v29 = vpop.eup %565 }
 0x1da   : > { %v361_v31 = vmul.f32 %v566_v29, %v353_v23 }
 0x1dc   : > { %v368_v33 = vmul.f32 %v502_v30, %v361_v31 }
 0x1de   : > { %v375_v34 = vadd.f32 %v503_v32, %v368_v33 }
 0x1e0   : > { %376 = vst.msk [vmem:[%s298_s16] sm:$0xff] %vm348_vm4, %v375_v34 }
 0x1e1   : > { %580 = shalt.err (!%p577_p5)
}
 0x1e2   : > { %s581_s30 = scalar_lea.hbm %s766_s20, 128  ;;  %s585_s14 = scalar_lea.hbm %s820_s6, 256 }
 0x1e3   : > { %p582_p6 = scmp.ne.s32.totalorder %s766_s20, %s581_s30  ;;  %p586_p10 = scmp.lt.u32.totalorder %s766_s20, %s820_s6 }
 0x1e4   : > { %p587_p11 = scmp.lt.u32.totalorder %s585_s14, %s581_s30  ;;  %p589_p13 = scmp.lt.u32.totalorder %s581_s30, %s766_s20 }
 0x1e5   : > { %p583_p7 = pnand %p582_p6, %p724_p4 }
 0x1e6   : > { %p588_p12 = por %p587_p11, %p586_p10 }
 0x1e7   : > { %p584_p9 = pneg %p583_p7 }
 0x1e8   : > { %p590_p0 = por %p589_p13, %p588_p12 }
 0x1ea   : > { %p591_p1 = pnand %p590_p0, %p584_p9 }
 0x1ec   : > { %594 = shalt.err (!%p591_p1)
}
 0x1ed   : > { %508 = dma.vmem_to_hbm [thread:$0]  (%p724_p4), %s768_s17, 128, %s766_s20, %s378_s27  }
 0x1ee PF: > { %p514_p2 = scmp.ge.s32.totalorder %s645_s26, 2  ;;  %s404_s18 = sand.u32 1, %s625_s21  }
 0x1ef   : > { %s405_s19 = scalar_lea.sflag [#allocation3], %s404_s18 }
 0x1f0   : > { %p511_p3 = pnand %p514_p2, %p731_p8 }
 0x1f2   : > { %620 = dma.done.wait (!%p511_p3), %s405_s19, 128  }
 0x1f3   : > { %622 = vsyncadd (!%p511_p3), %s405_s19, 4294967168  ;;  %s19_s26 = sadd.s32 1, %s645_s26   ;;  %s823_s21 = smov %s629_s22 }
 0x1f4   : > { %p16_p5 = scmp.ge.s32.totalorder %s19_s26, 4   ;;  %s824_s22 = smov %s633_s23 }
 0x1f5   : > { %s825_s23 = smov %s737_s10  ;;  %s826_s24 = smov %s641_s25 }
 0x1f6   : > { %s827_s25 = smov %s829_s29  ;;  %18 = sbr.rel (!%p16_p5) target bundleno = 4 (0x4), region = 85 }
 0x1fd   :  { %410 = vsyncpa [#allocation3], 1 }
 0x1fe   :  { %412 = vsyncpa [#allocation3 + $0x1], 1 }

</bundles_post_ra>
